<compile_context>
chip_gen: v7x
topology: tpu7x:2x2x1
jax: 0.10.0
libtpu: 0.0.40
codegen_flags: <defaults>
</compile_context>

<pallas_src>
import jax
import jax.numpy as jnp
from jax.experimental import pallas as pl
from jax.experimental.pallas import tpu as pltpu

_N_OUT = 11  # 1 (bowel) + 1 (extravasation) + 3 (kidney) + 3 (liver) + 3 (spleen)


def _make_kernel(pooling_type, ht, hw_valid, mask_last_tile):
    """Kernel: accumulate sum/max over HW tiles, finalize heads on last step."""
    need_sum = pooling_type in ("avg", "concat")
    need_max = pooling_type in ("max", "concat")
    inv_hw = 1.0 / float(hw_valid)

    def kernel(*refs):
        it = iter(refs)
        x_ref = next(it)                                  # (bt, ht, C)
        wa_ref = next(it) if need_sum else None           # (C, 11)
        wm_ref = next(it) if need_max else None           # (C, 11)
        b_ref = next(it)                                  # (1, 11)
        o_ref = next(it)                                  # (bt, 11)
        sum_ref = next(it) if need_sum else None          # (bt, C) f32 scratch
        max_ref = next(it) if need_max else None          # (bt, C) f32 scratch

        k = pl.program_id(1)
        n_k = pl.num_programs(1)

        @pl.when(k == 0)
        def _init():
            if need_sum:
                sum_ref[...] = jnp.zeros_like(sum_ref)
            if need_max:
                max_ref[...] = jnp.full_like(max_ref, -jnp.inf)

        # Upcast in-register; accumulation is always f32.
        x = x_ref[...].astype(jnp.float32)                # (bt, ht, C)

        if mask_last_tile:
            row = jax.lax.broadcasted_iota(jnp.int32, (ht, 1), 0)
            valid = (k * ht + row) < hw_valid             # (ht, 1) -> bcast (bt, ht, C)
            x_sum = jnp.where(valid, x, 0.0) if need_sum else None
            x_max = jnp.where(valid, x, -jnp.inf) if need_max else None
        else:
            x_sum = x if need_sum else None
            x_max = x if need_max else None

        # Sublane-axis reductions (VPU); pooled results stay lane-dense [bt, C].
        if need_sum:
            sum_ref[...] += jnp.sum(x_sum, axis=1)
        if need_max:
            max_ref[...] = jnp.maximum(max_ref[...], jnp.max(x_max, axis=1))

        @pl.when(k == n_k - 1)
        def _finalize():
            acc = b_ref[...]                              # (1, 11), broadcasts
            if need_sum:
                acc = acc + jnp.dot(sum_ref[...] * inv_hw, wa_ref[...],
                                    preferred_element_type=jnp.float32)
            if need_max:
                acc = acc + jnp.dot(max_ref[...], wm_ref[...],
                                    preferred_element_type=jnp.float32)
            o_ref[...] = acc

    return kernel


def pack_head_params(weights, biases):
    """Fuse the 5 PyTorch-convention Linear heads into one [fin, 11] weight, [1, 11] bias.

    (Do this once / under jit so it constant-folds instead of re-running per call.)
    """
    w_cat = jnp.concatenate([w.T for w in weights], axis=-1).astype(jnp.float32)
    b_cat = jnp.concatenate(biases, axis=-1).reshape(1, -1).astype(jnp.float32)
    return w_cat, b_cat


def classification_head(x_nchw, weights, biases, pooling_type, *,
                        max_rows_per_tile=None):
    """JAX/Pallas equivalent of ClassificationHead.forward.

    x_nchw : [B, C, H, W] (any float dtype; streamed in native dtype)
    weights: list of 5 arrays, PyTorch Linear convention [out_features, in_features]
    biases : list of 5 arrays [out_features]
    Returns (bowel [B,1], extravasation [B,1], kidney [B,3], liver [B,3], spleen [B,3]).
    """
    if pooling_type not in ("avg", "max", "concat"):
        raise ValueError(f"unknown pooling_type: {pooling_type}")
    need_sum = pooling_type in ("avg", "concat")
    need_max = pooling_type in ("max", "concat")

    B, C, H, W = x_nchw.shape
    HW = H * W
    fin = 2 * C if pooling_type == "concat" else C

    w_cat, b_cat = pack_head_params(weights, biases)
    assert w_cat.shape == (fin, _N_OUT)
    if pooling_type == "concat":
        w_avg, w_max = w_cat[:C], w_cat[C:]    # concat order is [avg, max]
    elif pooling_type == "avg":
        w_avg, w_max = w_cat, None
    else:
        w_avg, w_max = None, w_cat

    # Channels-last, native dtype (no f32 copy of the activation in HBM).
    # TODO(synk): if the backbone can emit NHWC activations directly, drop this transpose.
    x = jnp.transpose(x_nchw.reshape(B, C, HW), (0, 2, 1))   # [B, HW, C]

    # ---- tile selection ----
    if B <= 8:
        bt = B                                 # block == full dim, always legal
    else:
        bt = B
        for cand in (256, 128, 64, 32, 16, 8):  # multiple-of-8 batch tiles
            if B % cand == 0:
                bt = cand
                break

    itemsize = jnp.dtype(x.dtype).itemsize
    if max_rows_per_tile is not None:
        ht_cap = max(8, (int(max_rows_per_tile) // 8) * 8)
    else:
        # Keep the double-buffered x tile under ~16 MiB: safe within the scoped
        # VMEM defaults of every generation (v5e 16 MiB, v6e 32 MiB, v7x 32/64 MiB).
        budget = 16 * 1024 * 1024
        max_rows = max(8, budget // (2 * bt * C * itemsize))
        ht_cap = max(8, min(2048, (max_rows // 8) * 8))

    if HW <= ht_cap:
        ht, hw_pad = HW, HW
    else:
        ht = ht_cap                            # multiple of 8 by construction
        hw_pad = pl.cdiv(HW, ht) * ht
    mask_last_tile = hw_pad != HW
    if mask_last_tile:
        x = jnp.pad(x, ((0, 0), (0, hw_pad - HW), (0, 0)))

    grid = (B // bt, hw_pad // ht)

    inputs = [x]
    in_specs = [pl.BlockSpec((bt, ht, C), lambda i, k: (i, k, 0))]
    if need_sum:
        inputs.append(w_avg)
        in_specs.append(pl.BlockSpec((C, _N_OUT), lambda i, k: (0, 0)))
    if need_max:
        inputs.append(w_max)
        in_specs.append(pl.BlockSpec((C, _N_OUT), lambda i, k: (0, 0)))
    inputs.append(b_cat)
    in_specs.append(pl.BlockSpec((1, _N_OUT), lambda i, k: (0, 0)))

    scratch_shapes = []
    if need_sum:
        scratch_shapes.append(pltpu.VMEM((bt, C), jnp.float32))
    if need_max:
        scratch_shapes.append(pltpu.VMEM((bt, C), jnp.float32))

    n_pool = int(need_sum) + int(need_max)
    cost = pl.CostEstimate(
        flops=B * hw_pad * C * n_pool + 2 * B * fin * _N_OUT,
        transcendentals=0,
        bytes_accessed=B * hw_pad * C * itemsize
        + fin * _N_OUT * 4 + _N_OUT * 4 + B * _N_OUT * 4,
    )

    out = pl.pallas_call(
        _make_kernel(pooling_type, ht, HW, mask_last_tile),
        out_shape=jax.ShapeDtypeStruct((B, _N_OUT), jnp.float32),
        grid=grid,
        in_specs=in_specs,
        out_specs=pl.BlockSpec((bt, _N_OUT), lambda i, k: (i, 0)),
        scratch_shapes=scratch_shapes,
        compiler_params=pltpu.CompilerParams(
            dimension_semantics=("parallel", "arbitrary"),
            vmem_limit_bytes=32 * 1024 * 1024,
        ),
        cost_estimate=cost,
    )(*inputs)

    return (
        out[:, 0:1],   # bowel
        out[:, 1:2],   # extravasation
        out[:, 2:5],   # kidney
        out[:, 5:8],   # liver
        out[:, 8:11],  # spleen
    )


def _init_params(key, input_dimensions, pooling_type):
    """Deterministic PyTorch-Linear-style init (uniform +-1/sqrt(fan_in))."""
    fin = input_dimensions * 2 if pooling_type == "concat" else input_dimensions
    out_dims = [1, 1, 3, 3, 3]
    bound = 1.0 / (fin ** 0.5)
    weights, biases = [], []
    for o in out_dims:
        key, kw, kb = jax.random.split(key, 3)
        weights.append(jax.random.uniform(kw, (o, fin), jnp.float32, -bound, bound))
        biases.append(jax.random.uniform(kb, (o,), jnp.float32, -bound, bound))
    return weights, biases


def _reference(x_nchw, weights, biases, pooling_type):
    """Plain-JAX reference for correctness check (f32 accumulation)."""
    xf = x_nchw.astype(jnp.float32)
    avg = jnp.mean(xf, axis=(2, 3))
    mx = jnp.max(xf, axis=(2, 3))
    if pooling_type == "avg":
        feat = avg
    elif pooling_type == "max":
        feat = mx
    else:
        feat = jnp.concatenate([avg, mx], axis=-1)
    return tuple(feat @ w.T + b for w, b in zip(weights, biases))


if __name__ == "__main__":
    key = jax.random.PRNGKey(0)

    # (pooling_type, shape, dtype, max_rows_per_tile override)
    test_cases = [
        ("avg",    (2, 4, 16, 16), jnp.float32, None),
        ("max",    (2, 4, 16, 16), jnp.float32, None),
        ("concat", (2, 4, 16, 16), jnp.float32, None),
        ("concat", (2, 4, 16, 16), jnp.float32, 64),   # 4 HW tiles: exercises accumulation
        ("concat", (2, 4, 16, 16), jnp.float32, 48),   # ragged last tile (256 -> pad 288)
        ("concat", (2, 4, 16, 16), jnp.bfloat16, 64),  # native-dtype (bf16) streaming
    ]

    for pooling_type, shape, dtype, max_rows in test_cases:
        B, C, H, W = shape
        key, kx, kp = jax.random.split(key, 3)
        x = jax.random.normal(kx, shape, jnp.float32).astype(dtype)
        weights, biases = _init_params(kp, input_dimensions=C, pooling_type=pooling_type)

        outs = classification_head(x, weights, biases, pooling_type,
                                   max_rows_per_tile=max_rows)
        outs = jax.block_until_ready(outs)

        refs = _reference(x, weights, biases, pooling_type)
        for o, r in zip(outs, refs):
            assert o.shape == r.shape, (pooling_type, o.shape, r.shape)
            err = float(jnp.max(jnp.abs(o - r)))
            assert jnp.allclose(o, r, atol=2e-5, rtol=2e-5), (
                pooling_type, str(dtype), max_rows, err)

    print("KERNEL_OK")
</pallas_src>

<mosaic_0001>
module attributes {stable_mosaic.version = 11 : i64} {
  func.func @kernel(%arg0: i32, %arg1: i32, %arg2: memref<2x256x4xf32, #tpu.memory_space<vmem>>, %arg3: memref<4x11xf32, #tpu.memory_space<vmem>>, %arg4: memref<1x11xf32, #tpu.memory_space<vmem>>, %arg5: memref<2x11xf32, #tpu.memory_space<vmem>>, %arg6: memref<2x4xf32, #tpu.memory_space<vmem>>) attributes {dimension_semantics = [#tpu.dimension_semantics<parallel>, #tpu.dimension_semantics<arbitrary>], iteration_bounds = array<i64: 1, 1>, scalar_prefetch = 0 : i64, scratch_operands = 1 : i64, tpu.core_type = #tpu.core_type<tc>, window_params = [{transform_indices = @transform_0, window_bounds = array<i64: 2, 256, 4>}, {pipeline_mode = #tpu.pipeline_mode<synchronous>, transform_indices = @transform_1, window_bounds = array<i64: 4, 11>}, {pipeline_mode = #tpu.pipeline_mode<synchronous>, transform_indices = @transform_2, window_bounds = array<i64: 1, 11>}, {transform_indices = @transform_3, window_bounds = array<i64: 2, 11>}]} {
    %c0_i32 = arith.constant 0 : i32
    %0 = arith.cmpi eq, %arg1, %c0_i32 : i32
    %1 = arith.extui %0 : i1 to i32
    %c0_i32_0 = arith.constant 0 : i32
    %2 = arith.cmpi ne, %1, %c0_i32_0 : i32
    scf.if %2 {
      %cst_9 = arith.constant 0.000000e+00 : f32
      %11 = vector.broadcast %cst_9 : f32 to vector<2x4xf32>
      %c0_10 = arith.constant 0 : index
      %c0_11 = arith.constant 0 : index
      %12 = vector.load %arg6[%c0_10, %c0_11] : memref<2x4xf32, #tpu.memory_space<vmem>>, vector<2x4xf32>
      tpu.vector_store %arg6[%c0_10, %c0_11], %11 {strides = array<i32>} : memref<2x4xf32, #tpu.memory_space<vmem>>, vector<2x4xf32>,
    } else {
    }
    %c0 = arith.constant 0 : index
    %c0_1 = arith.constant 0 : index
    %c0_2 = arith.constant 0 : index
    %3 = vector.load %arg2[%c0, %c0_1, %c0_2] : memref<2x256x4xf32, #tpu.memory_space<vmem>>, vector<2x256x4xf32>
    %c0_3 = arith.constant 0 : index
    %c0_4 = arith.constant 0 : index
    %4 = vector.load %arg6[%c0_3, %c0_4] : memref<2x4xf32, #tpu.memory_space<vmem>>, vector<2x4xf32>
    %cst = arith.constant dense<0.000000e+00> : vector<2x4xf32>
    %5 = vector.multi_reduction <add>, %3, %cst [1] : vector<2x256x4xf32> to vector<2x4xf32>
    %6 = arith.addf %4, %5 : vector<2x4xf32>
    %c0_5 = arith.constant 0 : index
    %c0_6 = arith.constant 0 : index
    %7 = vector.load %arg6[%c0_5, %c0_6] : memref<2x4xf32, #tpu.memory_space<vmem>>, vector<2x4xf32>
    tpu.vector_store %arg6[%c0_5, %c0_6], %6 {strides = array<i32>} : memref<2x4xf32, #tpu.memory_space<vmem>>, vector<2x4xf32>,
    %c0_i32_7 = arith.constant 0 : i32
    %8 = arith.cmpi eq, %arg1, %c0_i32_7 : i32
    %9 = arith.extui %8 : i1 to i32
    %c0_i32_8 = arith.constant 0 : i32
    %10 = arith.cmpi ne, %9, %c0_i32_8 : i32
    scf.if %10 {
      %c0_9 = arith.constant 0 : index
      %c0_10 = arith.constant 0 : index
      %11 = vector.load %arg4[%c0_9, %c0_10] : memref<1x11xf32, #tpu.memory_space<vmem>>, vector<1x11xf32>
      %c0_11 = arith.constant 0 : index
      %c0_12 = arith.constant 0 : index
      %12 = vector.load %arg6[%c0_11, %c0_12] : memref<2x4xf32, #tpu.memory_space<vmem>>, vector<2x4xf32>
      %cst_13 = arith.constant 3.906250e-03 : f32
      %13 = vector.broadcast %cst_13 : f32 to vector<2x4xf32>
      %14 = arith.mulf %12, %13 : vector<2x4xf32>
      %c0_14 = arith.constant 0 : index
      %c0_15 = arith.constant 0 : index
      %15 = vector.load %arg3[%c0_14, %c0_15] : memref<4x11xf32, #tpu.memory_space<vmem>>, vector<4x11xf32>
      %cst_16 = arith.constant dense<0.000000e+00> : vector<2x11xf32>
      %16 = tpu.matmul %14, %15, %cst_16 {dimension_numbers = #tpu.dot_dimension_numbers<[1], [0], [0], [1], [0, 0, 1, 1], [], []>} : vector<2x4xf32>, vector<4x11xf32>, vector<2x11xf32> -> vector<2x11xf32>
      %17 = vector.broadcast %11 : vector<1x11xf32> to vector<2x11xf32>
      %18 = arith.addf %17, %16 : vector<2x11xf32>
      %c0_17 = arith.constant 0 : index
      %c0_18 = arith.constant 0 : index
      %19 = vector.load %arg5[%c0_17, %c0_18] : memref<2x11xf32, #tpu.memory_space<vmem>>, vector<2x11xf32>
      tpu.vector_store %arg5[%c0_17, %c0_18], %18 {strides = array<i32>} : memref<2x11xf32, #tpu.memory_space<vmem>>, vector<2x11xf32>,
    } else {
    }
    return
  }
  func.func @transform_0(%arg0: i32, %arg1: i32) -> (i32, i32, i32) {
    %c0_i32 = arith.constant 0 : i32
    %c0_i32_0 = arith.constant 0 : i32
    return %arg0, %arg1, %c0_i32 : i32, i32, i32
  }
  func.func @transform_1(%arg0: i32, %arg1: i32) -> (i32, i32) {
    %c0_i32 = arith.constant 0 : i32
    %c0_i32_0 = arith.constant 0 : i32
    %c0_i32_1 = arith.constant 0 : i32
    return %c0_i32, %c0_i32_0 : i32, i32
  }
  func.func @transform_2(%arg0: i32, %arg1: i32) -> (i32, i32) {
    %c0_i32 = arith.constant 0 : i32
    %c0_i32_0 = arith.constant 0 : i32
    %c0_i32_1 = arith.constant 0 : i32
    return %c0_i32, %c0_i32_0 : i32, i32
  }
  func.func @transform_3(%arg0: i32, %arg1: i32) -> (i32, i32) {
    %c0_i32 = arith.constant 0 : i32
    %c0_i32_0 = arith.constant 0 : i32
    return %arg0, %c0_i32 : i32, i32
  }
}

</mosaic_0001>

<bundles_post_ra>
// kernel: tpu_custom_call.1
= control target key start
LH: loop header
LB: loop body
LE: loop exit
PB: predicated region body
PF: predicated region fallthrough
CT: control target
= control target key end

     0   :  { %vm19_vm0 = vcmask 25600   ;;  %vm86_vm1 = vcmask 31744   ;;  %v377_v3 = vmov 0.0   ;;  %vm243_vm2 = vcmask 1043456   ;;  %s680_s0 = inlined_call_operand.vmem [shape: f32[2,256,4], index: 0, kind: input, shape index: {}]   ;;  %s681_s1 = inlined_call_operand.vmem [shape: f32[4,11], index: 1, kind: input, shape index: {}]   ;;  %s682_s2 = inlined_call_operand.vmem [shape: f32[1,11], index: 2, kind: input, shape index: {}]   ;;  %s683_s3 = inlined_call_operand.hbm [shape: f32[2,11], index: 3, kind: output, shape index: {}]  }
   0x1   :  { %v21_v0 = vld [vmem:[%s680_s0] sm:$0xff]  ;;  %v22_v1 = vld [vmem:[%s680_s0 + $0x8] sm:$0xff]  ;;  %v23_v2 = vld [vmem:[%s680_s0 + $0x10] sm:$0xff]  ;;  %20 = vst.msk [vmem:[#allocation2] sm:$0x3] %vm19_vm0, %v377_v3  ;;  %345 = vmatprep.subr.mxu0 %v377_v3 }
   0x2   :  { %v24_v4 = vld [vmem:[%s680_s0 + $0x18] sm:$0xff]  ;;  %v87_v5 = vsel %vm86_vm1, %v21_v0, 0.0  ;;  %v88_v6 = vsel %vm86_vm1, %v22_v1, 0.0  ;;  %v90_v7 = vsel %vm86_vm1, %v23_v2, 0.0  ;;  %v25_v8 = vld [vmem:[%s680_s0 + $0x20] sm:$0xff]  ;;  %v26_v11 = vld [vmem:[%s680_s0 + $0x28] sm:$0xff] }
   0x3   :  { %v89_v9 = vadd.f32 %v88_v6, %v87_v5  ;;  %v92_v10 = vsel %vm86_vm1, %v24_v4, 0.0  ;;  %v94_v13 = vsel %vm86_vm1, %v25_v8, 0.0  ;;  %v27_v14 = vld [vmem:[%s680_s0 + $0x30] sm:$0xff]  ;;  %v96_v16 = vsel %vm86_vm1, %v26_v11, 0.0  ;;  %v28_v17 = vld [vmem:[%s680_s0 + $0x38] sm:$0xff]  ;;  %v29_v20 = vld [vmem:[%s680_s0 + $0x40] sm:$0xff] }
   0x4   :  { %v98_v19 = vsel %vm86_vm1, %v27_v14, 0.0  ;;  %v53_v21 = vld [vmem:[%s680_s0 + $0x100] sm:$0xff]  ;;  %v54_v23 = vld [vmem:[%s680_s0 + $0x108] sm:$0xff]  ;;  %v55_v24 = vld [vmem:[%s680_s0 + $0x110] sm:$0xff]  ;;  %v100_v26 = vsel %vm86_vm1, %v28_v17, 0.0  ;;  %v102_v33 = vsel %vm86_vm1, %v29_v20, 0.0 }
   0x5   :  { %v91_v12 = vadd.f32 %v90_v7, %v89_v9  ;;  %v56_v25 = vld [vmem:[%s680_s0 + $0x118] sm:$0xff]  ;;  %v156_v27 = vsel %vm86_vm1, %v53_v21, 0.0  ;;  %v30_v28 = vld [vmem:[%s680_s0 + $0x48] sm:$0xff]  ;;  %v157_v30 = vsel %vm86_vm1, %v54_v23, 0.0  ;;  %v159_v31 = vsel %vm86_vm1, %v55_v24, 0.0  ;;  %v57_v32 = vld [vmem:[%s680_s0 + $0x120] sm:$0xff] }
   0x6   :  { %v158_v34 = vadd.f32 %v157_v30, %v156_v27  ;;  %v31_v35 = vld [vmem:[%s680_s0 + $0x50] sm:$0xff]  ;;  %v161_v37 = vsel %vm86_vm1, %v56_v25, 0.0  ;;  %v58_v38 = vld [vmem:[%s680_s0 + $0x128] sm:$0xff]  ;;  %v104_v39 = vsel %vm86_vm1, %v30_v28, 0.0  ;;  %v32_v41 = vld [vmem:[%s680_s0 + $0x58] sm:$0xff]  ;;  %v163_v43 = vsel %vm86_vm1, %v57_v32, 0.0 }
   0x7   :  { %v93_v15 = vadd.f32 %v92_v10, %v91_v12  ;;  %v59_v44 = vld [vmem:[%s680_s0 + $0x130] sm:$0xff]  ;;  %v106_v45 = vsel %vm86_vm1, %v31_v35, 0.0  ;;  %v33_v47 = vld [vmem:[%s680_s0 + $0x60] sm:$0xff]  ;;  %v165_v49 = vsel %vm86_vm1, %v58_v38, 0.0  ;;  %v60_v50 = vld [vmem:[%s680_s0 + $0x138] sm:$0xff]  ;;  %v108_v51 = vsel %vm86_vm1, %v32_v41, 0.0 }
   0x8   :  { %v160_v40 = vadd.f32 %v159_v31, %v158_v34  ;;  %v34_v53 = vld [vmem:[%s680_s0 + $0x68] sm:$0xff]  ;;  %v167_v55 = vsel %vm86_vm1, %v59_v44, 0.0  ;;  %v61_v56 = vld [vmem:[%s680_s0 + $0x140] sm:$0xff]  ;;  %v110_v57 = vsel %vm86_vm1, %v33_v47, 0.0  ;;  %v35_v59 = vld [vmem:[%s680_s0 + $0x70] sm:$0xff]  ;;  %v169_v61 = vsel %vm86_vm1, %v60_v50, 0.0 }
   0x9   :  { %v95_v18 = vadd.f32 %v94_v13, %v93_v15  ;;  %v239_v62 = vld [vmem:[%s681_s1] sm:$0xf]  ;;  %v62_v63 = vld [vmem:[%s680_s0 + $0x148] sm:$0xff]  ;;  %v112_v0 = vsel %vm86_vm1, %v34_v53, 0.0 }
   0xa   :  { %v162_v46 = vadd.f32 %v161_v37, %v160_v40  ;;  %346 = vmatpush3.msk.msra.mxu0 %vm243_vm2, %v239_v62 }
   0xb   :  { %v97_v22 = vadd.f32 %v96_v16, %v95_v18 }
   0xc   :  { %v164_v52 = vadd.f32 %v163_v43, %v162_v46 }
   0xd   :  { %v99_v29 = vadd.f32 %v98_v19, %v97_v22 }
   0xe   :  { %v166_v58 = vadd.f32 %v165_v49, %v164_v52 }
   0xf   :  { %v101_v36 = vadd.f32 %v100_v26, %v99_v29 }
  0x10   :  { %v168_v1 = vadd.f32 %v167_v55, %v166_v58 }
  0x11   :  { %v103_v42 = vadd.f32 %v102_v33, %v101_v36 }
  0x13   :  { %v105_v48 = vadd.f32 %v104_v39, %v103_v42 }
  0x15   :  { %v107_v54 = vadd.f32 %v106_v45, %v105_v48 }
  0x17   :  { %v109_v60 = vadd.f32 %v108_v51, %v107_v54 }
  0x18   :  { %8 = vsyncpa [#allocation4], 0  ;;  %v36_v2 = vld [vmem:[%s680_s0 + $0x78] sm:$0xff]  ;;  %v171_v5 = vsel %vm86_vm1, %v61_v56, 0.0  ;;  %vm378_vm3 = vmmov 0   ;;  %v63_v6 = vld [vmem:[%s680_s0 + $0x150] sm:$0xff]  ;;  %v170_v8 = vadd.f32 %v169_v61, %v168_v1 }
  0x19   :  { %v111_v4 = vadd.f32 %v110_v57, %v109_v60  ;;  %347 = vmatprep.mubr.msk.f32.mxu0 %vm378_vm3, %v377_v3  ;;  %v114_v7 = vsel %vm86_vm1, %v35_v59, 0.0  ;;  %v37_v9 = vld [vmem:[%s680_s0 + $0x80] sm:$0xff]  ;;  %v173_v11 = vsel %vm86_vm1, %v62_v63, 0.0  ;;  %v64_v12 = vld [vmem:[%s680_s0 + $0x158] sm:$0xff]  ;;  %v116_v3 = vsel %vm86_vm1, %v36_v2, 0.0  ;;  %v38_v14 = vld [vmem:[%s680_s0 + $0x88] sm:$0xff] }
  0x1a   :  { %v172_v13 = vadd.f32 %v171_v5, %v170_v8  ;;  %v175_v16 = vsel %vm86_vm1, %v63_v6, 0.0  ;;  %v65_v17 = vld [vmem:[%s680_s0 + $0x160] sm:$0xff]  ;;  %v118_v18 = vsel %vm86_vm1, %v37_v9, 0.0  ;;  %v39_v20 = vld [vmem:[%s680_s0 + $0x90] sm:$0xff]  ;;  %v177_v22 = vsel %vm86_vm1, %v64_v12, 0.0  ;;  %v66_v23 = vld [vmem:[%s680_s0 + $0x168] sm:$0xff] }
  0x1b   :  { %v113_v10 = vadd.f32 %v112_v0, %v111_v4  ;;  %v120_v24 = vsel %vm86_vm1, %v38_v14, 0.0  ;;  %v40_v26 = vld [vmem:[%s680_s0 + $0x98] sm:$0xff]  ;;  %v179_v28 = vsel %vm86_vm1, %v65_v17, 0.0  ;;  %v67_v29 = vld [vmem:[%s680_s0 + $0x170] sm:$0xff]  ;;  %v122_v30 = vsel %vm86_vm1, %v39_v20, 0.0  ;;  %v41_v32 = vld [vmem:[%s680_s0 + $0xa0] sm:$0xff] }
  0x1c   :  { %v174_v19 = vadd.f32 %v173_v11, %v172_v13  ;;  %v181_v34 = vsel %vm86_vm1, %v66_v23, 0.0  ;;  %v68_v35 = vld [vmem:[%s680_s0 + $0x178] sm:$0xff]  ;;  %v124_v36 = vsel %vm86_vm1, %v40_v26, 0.0  ;;  %v42_v38 = vld [vmem:[%s680_s0 + $0xa8] sm:$0xff]  ;;  %v183_v40 = vsel %vm86_vm1, %v67_v29, 0.0  ;;  %v69_v41 = vld [vmem:[%s680_s0 + $0x180] sm:$0xff] }
  0x1d   :  { %v115_v15 = vadd.f32 %v114_v7, %v113_v10  ;;  %v126_v42 = vsel %vm86_vm1, %v41_v32, 0.0  ;;  %v43_v44 = vld [vmem:[%s680_s0 + $0xb0] sm:$0xff]  ;;  %v185_v46 = vsel %vm86_vm1, %v68_v35, 0.0  ;;  %v70_v47 = vld [vmem:[%s680_s0 + $0x188] sm:$0xff]  ;;  %v128_v48 = vsel %vm86_vm1, %v42_v38, 0.0  ;;  %v44_v50 = vld [vmem:[%s680_s0 + $0xb8] sm:$0xff] }
  0x1e   :  { %v176_v25 = vadd.f32 %v175_v16, %v174_v19  ;;  %v187_v52 = vsel %vm86_vm1, %v69_v41, 0.0  ;;  %v71_v53 = vld [vmem:[%s680_s0 + $0x190] sm:$0xff]  ;;  %v130_v54 = vsel %vm86_vm1, %v43_v44, 0.0  ;;  %v45_v56 = vld [vmem:[%s680_s0 + $0xc0] sm:$0xff]  ;;  %v189_v58 = vsel %vm86_vm1, %v70_v47, 0.0  ;;  %v72_v59 = vld [vmem:[%s680_s0 + $0x198] sm:$0xff] }
  0x1f   :  { %v117_v21 = vadd.f32 %v116_v3, %v115_v15  ;;  %v132_v60 = vsel %vm86_vm1, %v44_v50, 0.0  ;;  %v46_v62 = vld [vmem:[%s680_s0 + $0xc8] sm:$0xff]  ;;  %v191_v0 = vsel %vm86_vm1, %v71_v53, 0.0  ;;  %v73_v1 = vld [vmem:[%s680_s0 + $0x1a0] sm:$0xff]  ;;  %v134_v2 = vsel %vm86_vm1, %v45_v56, 0.0  ;;  %v47_v5 = vld [vmem:[%s680_s0 + $0xd0] sm:$0xff] }
  0x20   :  { %v178_v31 = vadd.f32 %v177_v22, %v176_v25  ;;  %v193_v7 = vsel %vm86_vm1, %v72_v59, 0.0  ;;  %v74_v8 = vld [vmem:[%s680_s0 + $0x1a8] sm:$0xff]  ;;  %v136_v9 = vsel %vm86_vm1, %v46_v62, 0.0  ;;  %v48_v11 = vld [vmem:[%s680_s0 + $0xd8] sm:$0xff]  ;;  %v195_v3 = vsel %vm86_vm1, %v73_v1, 0.0  ;;  %v75_v13 = vld [vmem:[%s680_s0 + $0x1b0] sm:$0xff] }
  0x21   :  { %v119_v27 = vadd.f32 %v118_v18, %v117_v21  ;;  %v138_v14 = vsel %vm86_vm1, %v47_v5, 0.0  ;;  %v49_v16 = vld [vmem:[%s680_s0 + $0xe0] sm:$0xff]  ;;  %v197_v18 = vsel %vm86_vm1, %v74_v8, 0.0  ;;  %v76_v19 = vld [vmem:[%s680_s0 + $0x1b8] sm:$0xff]  ;;  %v140_v20 = vsel %vm86_vm1, %v48_v11, 0.0  ;;  %v50_v22 = vld [vmem:[%s680_s0 + $0xe8] sm:$0xff] }
  0x22   :  { %v180_v37 = vadd.f32 %v179_v28, %v178_v31  ;;  %v77_v25 = vld [vmem:[%s680_s0 + $0x1c0] sm:$0xff]  ;;  %v142_v26 = vsel %vm86_vm1, %v49_v16, 0.0  ;;  %v51_v28 = vld [vmem:[%s680_s0 + $0xf0] sm:$0xff]  ;;  %v78_v31 = vld [vmem:[%s680_s0 + $0x1c8] sm:$0xff]  ;;  %v144_v32 = vsel %vm86_vm1, %v50_v22, 0.0  ;;  %vm227_vm4 = vcmask 1041409  }
  0x23   :  { %v121_v33 = vadd.f32 %v120_v24, %v119_v27  ;;  %v199_v24 = vsel %vm86_vm1, %v75_v13, 0.0  ;;  %v146_v38 = vsel %vm86_vm1, %v51_v28, 0.0  ;;  %v205_v41 = vsel %vm86_vm1, %v78_v31, 0.0  ;;  %v81_v47 = vld [vmem:[%s680_s0 + $0x1e0] sm:$0xff]  ;;  %s379_s5 = smov [#allocation3]  }
  0x24   :  { %v182_v43 = vadd.f32 %v181_v34, %v180_v37  ;;  %v52_v34 = vld [vmem:[%s680_s0 + $0xf8] sm:$0xff]  ;;  %v79_v37 = vld [vmem:[%s680_s0 + $0x1d0] sm:$0xff]  ;;  %s332_s6 = sshll.u32 %s379_s5, 4  ;;  %vm324_vm5 = vcmask 82944   ;;  %s333_s6 = int_to_ptr.vmem [resolvable:$true] %s332_s6 }
  0x25   :  { %v123_v39 = vadd.f32 %v122_v30, %v121_v33  ;;  %v201_v30 = vsel %vm86_vm1, %v76_v19, 0.0  ;;  %s353_s7 = scalar_lea.vmem %s333_s6, 32  ;;  %p358_p1 = scmp.lt.s32.totalorder %s333_s6, %s333_s6 }
  0x26   :  { %v184_v49 = vadd.f32 %v183_v40, %v182_v43  ;;  %v148_v43 = vsel %vm86_vm1, %v52_v34, 0.0  ;;  %p354_p0 = scmp.ne.s32.totalorder %s333_s6, %s353_s7  ;;  %p359_p2 = scmp.lt.s32.totalorder %s353_s7, %s353_s7 }
  0x27   :  { %v125_v45 = vadd.f32 %v124_v36, %v123_v39  ;;  %v203_v36 = vsel %vm86_vm1, %v77_v25, 0.0 }
  0x28   :  { %v186_v55 = vadd.f32 %v185_v46, %v184_v49  ;;  %v207_v46 = vsel %vm86_vm1, %v79_v37, 0.0  ;;  %p360_p3 = por %p359_p2, %p358_p1 }
  0x29   :  { %v127_v51 = vadd.f32 %v126_v42, %v125_v45  ;;  %v80_v42 = vld [vmem:[%s680_s0 + $0x1d8] sm:$0xff] }
  0x2a   :  { %v188_v61 = vadd.f32 %v187_v52, %v186_v55  ;;  %v209_v50 = vsel %vm86_vm1, %v80_v42, 0.0  ;;  %v83_v55 = vld [vmem:[%s680_s0 + $0x1f0] sm:$0xff]  ;;  %p361_p4 = pnand %p360_p3, %p354_p0 }
  0x2b   :  { %v129_v57 = vadd.f32 %v128_v48, %v127_v51  ;;  %v82_v51 = vld [vmem:[%s680_s0 + $0x1e8] sm:$0xff] }
  0x2c   :  { %v190_v4 = vadd.f32 %v189_v58, %v188_v61  ;;  %v84_v58 = vld [vmem:[%s680_s0 + $0x1f8] sm:$0xff]  ;;  %v215_v61 = vsel %vm86_vm1, %v83_v55, 0.0 }
  0x2d   :  { %v131_v63 = vadd.f32 %v130_v54, %v129_v57  ;;  %v211_v54 = vsel %vm86_vm1, %v81_v47, 0.0  ;;  %v213_v57 = vsel %vm86_vm1, %v82_v51, 0.0 }
  0x2e   :  { %v192_v10 = vadd.f32 %v191_v0, %v190_v4 }
  0x2f   :  { %v133_v6 = vadd.f32 %v132_v60, %v131_v63  ;;  %v217_v63 = vsel %vm86_vm1, %v84_v58, 0.0 }
  0x30   :  { %v194_v15 = vadd.f32 %v193_v7, %v192_v10 }
  0x31   :  { %v135_v12 = vadd.f32 %v134_v2, %v133_v6 }
  0x32   :  { %v196_v21 = vadd.f32 %v195_v3, %v194_v15 }
  0x33   :  { %v137_v17 = vadd.f32 %v136_v9, %v135_v12  ;;  %v85_v12 = vld [vmem:[#allocation2] sm:$0x3] }
  0x34   :  { %v198_v27 = vadd.f32 %v197_v18, %v196_v21 }
  0x35   :  { %v139_v23 = vadd.f32 %v138_v14, %v137_v17  ;;  %v342_v17 = vld [vmem:[%s682_s2] ss:$0 sm:$0xff] }
  0x36   :  { %v200_v33 = vadd.f32 %v199_v24, %v198_v27 }
  0x37   :  { %v141_v29 = vadd.f32 %v140_v20, %v139_v23 }
  0x38   :  { %v202_v39 = vadd.f32 %v201_v30, %v200_v33 }
  0x39   :  { %v143_v35 = vadd.f32 %v142_v26, %v141_v29 }
  0x3a   :  { %v204_v44 = vadd.f32 %v203_v36, %v202_v39 }
  0x3b   :  { %v145_v40 = vadd.f32 %v144_v32, %v143_v35 }
  0x3c   :  { %v206_v48 = vadd.f32 %v205_v41, %v204_v44 }
  0x3d   :  { %v147_v45 = vadd.f32 %v146_v38, %v145_v40 }
  0x3e   :  { %v208_v52 = vadd.f32 %v207_v46, %v206_v48 }
  0x3f   :  { %v149_v49 = vadd.f32 %v148_v43, %v147_v45 }
  0x40   :  { %v210_v56 = vadd.f32 %v209_v50, %v208_v52 }
  0x41   :  { %v150_v53 = vrot.slane %v149_v49, 4 }
  0x42   :  { %v212_v60 = vadd.f32 %v211_v54, %v210_v56 }
  0x43   :  { %v151_v59 = vadd.f32 %v150_v53, %v149_v49 }
  0x44   :  { %v214_v62 = vadd.f32 %v213_v57, %v212_v60 }
  0x45   :  { %v152_v0 = vrot.slane %v151_v59, 2 }
  0x46   :  { %v216_v1 = vadd.f32 %v215_v61, %v214_v62 }
  0x47   :  { %v153_v4 = vadd.f32 %v152_v0, %v151_v59 }
  0x48   :  { %v218_v2 = vadd.f32 %v217_v63, %v216_v1 }
  0x49   :  { %v154_v7 = vrot.slane %v153_v4, 1 }
  0x4a   :  { %v219_v5 = vrot.slane %v218_v2, 4 }
  0x4b   :  { %v155_v10 = vadd.f32 %v154_v7, %v153_v4 }
  0x4c   :  { %v220_v6 = vadd.f32 %v219_v5, %v218_v2 }
  0x4e   :  { %v221_v8 = vrot.slane %v220_v6, 2 }
  0x50   :  { %v222_v9 = vadd.f32 %v221_v8, %v220_v6 }
  0x52   :  { %v223_v11 = vrot.slane %v222_v9, 1 }
  0x54   :  { %v224_v3 = vadd.f32 %v223_v11, %v222_v9 }
  0x56   :  { %v228_v13 = vsel %vm227_vm4, %v224_v3, %v155_v10 }
  0x57   :  { %v230_v14 = vadd.f32 %v228_v13, %v85_v12 }
  0x59   :  { %232 = vst.msk [vmem:[#allocation2] sm:$0x3] %vm19_vm0, %v230_v14 }
  0x60   :  { %v237_v15 = vld [vmem:[#allocation2] sm:$0x3] }
  0x61   :  { %v238_v16 = vmul.f32 0.00390625, %v237_v15 }
  0x63   :  { %348 = vmatmul.mubr.msk.f32.vlgmr.msra.gmra.mrb[0].mxu0 %vm86_vm1, %v238_v16 }
 0x136   :  { %v313_v18 = vpop.f32.mrb[0].mxu0 }
 0x137   :  { %v323_v19 = vadd.f32 %v342_v17, %v313_v18  ;;  %v349_v20 = vpop.f32.mrb[1].mxu0 }
 0x139   :  { %325 = vst.msk [vmem:[#allocation3] sm:$0x3] %vm324_vm5, %v323_v19 }
 0x13a   :  { %364 = shalt.err (!%p361_p4)
}
 0x13b   :  { %s365_s10 = scalar_lea.hbm %s683_s3, 32 }
 0x13c   :  { %p366_p5 = scmp.ne.s32.totalorder %s683_s3, %s365_s10  ;;  %p369_p6 = scmp.lt.u32.totalorder %s365_s10, %s683_s3 }
 0x13e   :  { %p371_p7 = pnand %p369_p6, %p366_p5 }
 0x140   :  { %374 = shalt.err (!%p371_p7)
}
 0x141   :  { %335 = dma.vmem_to_hbm [thread:$0]  %s333_s6, 32, %s683_s3, [#allocation4]  }
 0x142   :  { %375 = dma.done.wait [#allocation4], 32  }
 0x143   :  { %376 = vsyncadd [#allocation4], 4294967264 }
 0x144   :  { %339 = vsyncpa [#allocation4], 1 }

</bundles_post_ra>
